<compile_context>
chip_gen: v6e
topology: v6e:2x2x1
jax: 0.10.0
libtpu: 0.0.40
codegen_flags: <defaults>
</compile_context>

<pallas_src>
import functools

import jax
import jax.numpy as jnp
from jax.experimental import pallas as pl
from jax.experimental.pallas import tpu as pltpu


_NEG_SLOPE = 0.01  # PyTorch nn.LeakyReLU default negative_slope


def _round_up(x: int, m: int) -> int:
    return (x + m - 1) // m * m


def _cdiv(a: int, b: int) -> int:
    return -(-a // b)


@functools.lru_cache(maxsize=None)
def _eltwise_bf16_default() -> bool:
    # v5e/v5p have no bf16 VALU -> keep the elementwise path in f32 there.
    try:
        return "v5" not in jax.devices()[0].device_kind.lower()
    except Exception:
        return True


def _make_mlp_kernel(n_layers: int, n_chunks: int, eltwise_bf16: bool,
                     negative_slope: float = _NEG_SLOPE):
    """Fused MLP kernel. Signature: (x_ref, w0, b0, ..., w_{L-1}, b_{L-1}, o_ref)."""

    def kernel(*refs):
        x_ref = refs[0]
        o_ref = refs[-1]
        prm = refs[1:-1]

        # MXU runs bf16 at full rate on v5e/v6e/v7x; accumulate in f32.
        h = x_ref[...].astype(jnp.bfloat16)

        for li in range(n_layers - 1):
            w_ref, b_ref = prm[2 * li], prm[2 * li + 1]
            acc = jnp.dot(h, w_ref[...], preferred_element_type=jnp.float32)
            if eltwise_bf16:
                # bias + LeakyReLU on bf16 vregs: ~2x fewer VALU ops (v6e/v7x).
                hb = acc.astype(jnp.bfloat16) + b_ref[...]
                h = jnp.maximum(hb, negative_slope * hb)
            else:
                hb = acc + b_ref[...].astype(jnp.float32)
                h = jnp.maximum(hb, negative_slope * hb).astype(jnp.bfloat16)

        # Final layer + sigmoid in f32.
        w_ref, b_ref = prm[-2], prm[-1]
        # TODO(synk): on v5e route this packed N=8 matmul to the VPU/XLU
        # (broadcast-multiply + segmented lane reduction) to save ~25% of MXU pushes.
        y = jnp.dot(h, w_ref[...], preferred_element_type=jnp.float32)
        y = y + b_ref[...]
        # sigmoid = 1/(1+exp(-y)); exp and approx reciprocal both use the EUP slot.
        out = pl.reciprocal(1.0 + jnp.exp(-y), approx=True).astype(o_ref.dtype)

        if n_chunks == 1:
            o_ref[...] = out
        else:
            # Lane-dense store: lay n_chunks consecutive row-chunks of the (TB, P)
            # result side by side in lanes so the output block is a dense
            # (TB/n_chunks, 128) slab -> contiguous HBM writeback DMA.
            tb, p = out.shape
            tbo = tb // n_chunks
            for j in range(n_chunks):
                o_ref[:, j * p:(j + 1) * p] = out[j * tbo:(j + 1) * tbo, :]

    return kernel


def _block_diag(w, p: int):
    """[in, out] -> block-diagonal [p*in, p*out] (p copies of w on the diagonal)."""
    if p == 1:
        return w
    i, o = w.shape
    eye = jnp.eye(p, dtype=w.dtype)
    return (eye[:, None, :, None] * w[None, :, None, :]).reshape(p * i, p * o)


def pack_params(params, input_dim: int):
    """One-time packing of weights for the kernel: P samples per 128-lane row via
    block-diagonal bf16 weights and lane-tiled biases.  Call once at init, not
    per forward pass."""
    p = max(1, min(8, 128 // max(input_dim, 1)))     # D=16 -> P=8 -> 128 lanes full
    n_layers = len(params) // 2
    packed = []
    for li in range(n_layers):
        w, b = params[2 * li], params[2 * li + 1]
        last = li == n_layers - 1
        packed.append(_block_diag(w, p).astype(jnp.bfloat16))
        bt = jnp.tile(jnp.reshape(b, (1, -1)), (1, p))
        packed.append(bt.astype(jnp.float32 if last else jnp.bfloat16))
    return packed


@jax.jit
def mine_forward(x, packed_params):
    """sigmoid(MLP(x)) fused in one Pallas kernel. x: [B, D] -> [B, 1]."""
    B, D = x.shape
    out_dtype = x.dtype
    n_layers = len(packed_params) // 2
    P = packed_params[0].shape[0] // D              # samples packed per row
    PD = P * D

    # ---- pack P samples per row: pad <= P-1 rows, then a free row-major view ----
    Bp = _cdiv(B, P)
    if Bp * P != B:
        x = jnp.pad(x, ((0, Bp * P - B), (0, 0)))
    x_packed = x.reshape(Bp, PD)                    # cast to bf16 happens in-kernel

    # ---- lane-dense output layout ----------------------------------------------
    n_chunks = (128 // P) if (P > 1 and 128 % P == 0) else 1
    out_lanes = n_chunks * P                        # 128 when packing is active

    # ---- adaptive batch tile ------------------------------------------------------
    align = max(16, 8 * n_chunks)                   # bf16 sublanes + chunked output
    TB = min(max(512, _round_up(_cdiv(Bp, 8), align)),   # aim for >= ~8 grid steps
             2048,                                        # bound spills / v7x VMEM
             _round_up(Bp, align))
    G = _cdiv(Bp, TB)                               # ragged last tile masked by Pallas
    TBo = TB // n_chunks

    kernel = _make_mlp_kernel(n_layers, n_chunks, _eltwise_bf16_default())

    x_spec = pl.BlockSpec((TB, PD), lambda i: (i, 0))
    # Weights/biases are tiny: full-extent blocks, VMEM-resident across the grid.
    w_specs = [pl.BlockSpec(prm.shape, lambda i: (0, 0)) for prm in packed_params]
    out_spec = pl.BlockSpec((TBo, out_lanes), lambda i: (i, 0))

    out = pl.pallas_call(
        kernel,
        out_shape=jax.ShapeDtypeStruct((G * TBo, out_lanes), jnp.float32),
        grid=(G,),
        in_specs=[x_spec] + w_specs,
        out_specs=out_spec,
        compiler_params=pltpu.CompilerParams(
            # batch axis is embarrassingly parallel -> shards across v7x's 2 TCs
            dimension_semantics=("parallel",),
            vmem_limit_bytes=32 * 1024 * 1024,
        ),
    )(x_packed, *packed_params)

    # Undo the (row-chunk, lane-group) interleave of the lane-dense output:
    #   out[i*TBo + q, j*P + p]  <->  sample ((i*n_chunks + j)*TBo + q)*P + p
    if n_chunks > 1:
        res = jnp.transpose(out.reshape(G, TBo, n_chunks, P), (0, 2, 1, 3)).reshape(-1, 1)
    else:
        res = out.reshape(-1, 1)
    return res[:B].astype(out_dtype)


def init_params(key, input_dim, hidden_dim):
    """normal(std=0.02) weights, zero bias. Flat list [w0, b0, w1, b1, ...],
    w_i stored [in, out] (transpose of torch.nn.Linear.weight)."""
    dims = [input_dim] + list(hidden_dim) + [1]
    params = []
    for i in range(len(dims) - 1):
        key, sub = jax.random.split(key)
        w = 0.02 * jax.random.normal(sub, (dims[i], dims[i + 1]), dtype=jnp.float32)
        b = jnp.zeros((dims[i + 1],), dtype=jnp.float32)
        params += [w, b]
    return params


def mine_reference(x, params):
    """Pure-JAX f32 reference of the same forward pass."""
    n_layers = len(params) // 2
    h = x.astype(jnp.float32)
    for li in range(n_layers):
        w, b = params[2 * li], params[2 * li + 1]
        h = h @ w + b.reshape(1, -1)
        if li < n_layers - 1:
            h = jnp.where(h > 0, h, _NEG_SLOPE * h)
    return (1.0 / (1.0 + jnp.exp(-h))).astype(x.dtype)


if __name__ == "__main__":
    # MINE statistics network on a joint sample vector:
    # input_dim=16, hidden_dim=[32, 32].
    input_dim = 16
    hidden_dim = [32, 32]

    key = jax.random.PRNGKey(0)
    key_x, key_x2, key_p = jax.random.split(key, 3)
    params = init_params(key_p, input_dim, hidden_dim)
    packed = pack_params(params, input_dim)

    # Small case (single tile, one packed row).
    x_small = jax.random.normal(key_x, (8, input_dim), dtype=jnp.float32)
    out_small = jax.block_until_ready(mine_forward(x_small, packed))
    ref_small = mine_reference(x_small, params)
    assert out_small.shape == (8, 1), out_small.shape
    assert jnp.allclose(out_small, ref_small, atol=1e-2, rtol=0.0), (out_small, ref_small)

    # Larger case: exercises P-padding, multiple grid steps, the ragged last
    # tile and the lane-dense output un-interleave.
    x_big = jax.random.normal(key_x2, (5003, input_dim), dtype=jnp.float32)
    out_big = jax.block_until_ready(mine_forward(x_big, packed))
    ref_big = mine_reference(x_big, params)
    assert out_big.shape == (5003, 1), out_big.shape
    assert jnp.allclose(out_big, ref_big, atol=1e-2, rtol=0.0)

    print("KERNEL_OK")
</pallas_src>

<mosaic_0001>
module attributes {stable_mosaic.version = 11 : i64} {
  func.func @kernel(%arg0: i32, %arg1: memref<128x128xf32, #tpu.memory_space<vmem>>, %arg2: memref<128x256xbf16, #tpu.memory_space<vmem>>, %arg3: memref<1x256xbf16, #tpu.memory_space<vmem>>, %arg4: memref<256x256xbf16, #tpu.memory_space<vmem>>, %arg5: memref<1x256xbf16, #tpu.memory_space<vmem>>, %arg6: memref<256x8xbf16, #tpu.memory_space<vmem>>, %arg7: memref<1x8xf32, #tpu.memory_space<vmem>>, %arg8: memref<8x128xf32, #tpu.memory_space<vmem>>) attributes {dimension_semantics = [#tpu.dimension_semantics<parallel>], iteration_bounds = array<i64: 1>, scalar_prefetch = 0 : i64, scratch_operands = 0 : i64, tpu.core_type = #tpu.core_type<tc>, window_params = [{transform_indices = @transform_0, window_bounds = array<i64: 128, 128>}, {pipeline_mode = #tpu.pipeline_mode<synchronous>, transform_indices = @transform_1, window_bounds = array<i64: 128, 256>}, {pipeline_mode = #tpu.pipeline_mode<synchronous>, transform_indices = @transform_2, window_bounds = array<i64: 1, 256>}, {pipeline_mode = #tpu.pipeline_mode<synchronous>, transform_indices = @transform_3, window_bounds = array<i64: 256, 256>}, {pipeline_mode = #tpu.pipeline_mode<synchronous>, transform_indices = @transform_4, window_bounds = array<i64: 1, 256>}, {pipeline_mode = #tpu.pipeline_mode<synchronous>, transform_indices = @transform_5, window_bounds = array<i64: 256, 8>}, {pipeline_mode = #tpu.pipeline_mode<synchronous>, transform_indices = @transform_6, window_bounds = array<i64: 1, 8>}, {transform_indices = @transform_7, window_bounds = array<i64: 8, 128>}]} {
    %c0 = arith.constant 0 : index
    %c0_0 = arith.constant 0 : index
    %0 = vector.load %arg1[%c0, %c0_0] : memref<128x128xf32, #tpu.memory_space<vmem>>, vector<128x128xf32>
    %1 = arith.truncf %0 : vector<128x128xf32> to vector<128x128xbf16>
    %c0_1 = arith.constant 0 : index
    %c0_2 = arith.constant 0 : index
    %2 = vector.load %arg2[%c0_1, %c0_2] : memref<128x256xbf16, #tpu.memory_space<vmem>>, vector<128x256xbf16>
    %cst = arith.constant dense<0.000000e+00> : vector<128x256xf32>
    %3 = tpu.matmul %1, %2, %cst {dimension_numbers = #tpu.dot_dimension_numbers<[1], [0], [0], [1], [0, 0, 1, 1], [], []>} : vector<128x128xbf16>, vector<128x256xbf16>, vector<128x256xf32> -> vector<128x256xf32>
    %4 = arith.truncf %3 : vector<128x256xf32> to vector<128x256xbf16>
    %c0_3 = arith.constant 0 : index
    %c0_4 = arith.constant 0 : index
    %5 = vector.load %arg3[%c0_3, %c0_4] : memref<1x256xbf16, #tpu.memory_space<vmem>>, vector<1x256xbf16>
    %6 = vector.broadcast %5 : vector<1x256xbf16> to vector<128x256xbf16>
    %7 = arith.addf %4, %6 : vector<128x256xbf16>
    %cst_5 = arith.constant 1.000980e-02 : bf16
    %8 = vector.broadcast %cst_5 : bf16 to vector<128x256xbf16>
    %9 = arith.mulf %8, %7 : vector<128x256xbf16>
    %10 = arith.maximumf %7, %9 : vector<128x256xbf16>
    %c0_6 = arith.constant 0 : index
    %c0_7 = arith.constant 0 : index
    %11 = vector.load %arg4[%c0_6, %c0_7] : memref<256x256xbf16, #tpu.memory_space<vmem>>, vector<256x256xbf16>
    %cst_8 = arith.constant dense<0.000000e+00> : vector<128x256xf32>
    %12 = tpu.matmul %10, %11, %cst_8 {dimension_numbers = #tpu.dot_dimension_numbers<[1], [0], [0], [1], [0, 0, 1, 1], [], []>} : vector<128x256xbf16>, vector<256x256xbf16>, vector<128x256xf32> -> vector<128x256xf32>
    %13 = arith.truncf %12 : vector<128x256xf32> to vector<128x256xbf16>
    %c0_9 = arith.constant 0 : index
    %c0_10 = arith.constant 0 : index
    %14 = vector.load %arg5[%c0_9, %c0_10] : memref<1x256xbf16, #tpu.memory_space<vmem>>, vector<1x256xbf16>
    %15 = vector.broadcast %14 : vector<1x256xbf16> to vector<128x256xbf16>
    %16 = arith.addf %13, %15 : vector<128x256xbf16>
    %cst_11 = arith.constant 1.000980e-02 : bf16
    %17 = vector.broadcast %cst_11 : bf16 to vector<128x256xbf16>
    %18 = arith.mulf %17, %16 : vector<128x256xbf16>
    %19 = arith.maximumf %16, %18 : vector<128x256xbf16>
    %c0_12 = arith.constant 0 : index
    %c0_13 = arith.constant 0 : index
    %20 = vector.load %arg6[%c0_12, %c0_13] : memref<256x8xbf16, #tpu.memory_space<vmem>>, vector<256x8xbf16>
    %cst_14 = arith.constant dense<0.000000e+00> : vector<128x8xf32>
    %21 = tpu.matmul %19, %20, %cst_14 {dimension_numbers = #tpu.dot_dimension_numbers<[1], [0], [0], [1], [0, 0, 1, 1], [], []>} : vector<128x256xbf16>, vector<256x8xbf16>, vector<128x8xf32> -> vector<128x8xf32>
    %c0_15 = arith.constant 0 : index
    %c0_16 = arith.constant 0 : index
    %22 = vector.load %arg7[%c0_15, %c0_16] : memref<1x8xf32, #tpu.memory_space<vmem>>, vector<1x8xf32>
    %23 = vector.broadcast %22 : vector<1x8xf32> to vector<128x8xf32>
    %24 = arith.addf %21, %23 : vector<128x8xf32>
    %cst_17 = arith.constant 0.000000e+00 : f32
    %25 = vector.broadcast %cst_17 : f32 to vector<128x8xf32>
    %26 = arith.subf %25, %24 : vector<128x8xf32>
    %27 = math.exp %26 : vector<128x8xf32>
    %cst_18 = arith.constant 1.000000e+00 : f32
    %28 = vector.broadcast %cst_18 : f32 to vector<128x8xf32>
    %29 = arith.addf %28, %27 : vector<128x8xf32>
    %30 = tpu.reciprocal %29 {approx = true} : vector<128x8xf32> -> vector<128x8xf32>
    %31 = vector.extract_strided_slice %30 {offsets = [0, 0], sizes = [8, 8], strides = [1, 1]} : vector<128x8xf32> to vector<8x8xf32>
    %c0_19 = arith.constant 0 : index
    %c0_20 = arith.constant 0 : index
    %32 = vector.load %arg8[%c0_19, %c0_20] : memref<8x128xf32, #tpu.memory_space<vmem>>, vector<8x8xf32>
    tpu.vector_store %arg8[%c0_19, %c0_20], %31 {strides = array<i32>} : memref<8x128xf32, #tpu.memory_space<vmem>>, vector<8x8xf32>,
    %33 = vector.extract_strided_slice %30 {offsets = [8, 0], sizes = [8, 8], strides = [1, 1]} : vector<128x8xf32> to vector<8x8xf32>
    %c0_21 = arith.constant 0 : index
    %c8 = arith.constant 8 : index
    %34 = vector.load %arg8[%c0_21, %c8] : memref<8x128xf32, #tpu.memory_space<vmem>>, vector<8x8xf32>
    tpu.vector_store %arg8[%c0_21, %c8], %33 {strides = array<i32>} : memref<8x128xf32, #tpu.memory_space<vmem>>, vector<8x8xf32>,
    %35 = vector.extract_strided_slice %30 {offsets = [16, 0], sizes = [8, 8], strides = [1, 1]} : vector<128x8xf32> to vector<8x8xf32>
    %c0_22 = arith.constant 0 : index
    %c16 = arith.constant 16 : index
    %36 = vector.load %arg8[%c0_22, %c16] : memref<8x128xf32, #tpu.memory_space<vmem>>, vector<8x8xf32>
    tpu.vector_store %arg8[%c0_22, %c16], %35 {strides = array<i32>} : memref<8x128xf32, #tpu.memory_space<vmem>>, vector<8x8xf32>,
    %37 = vector.extract_strided_slice %30 {offsets = [24, 0], sizes = [8, 8], strides = [1, 1]} : vector<128x8xf32> to vector<8x8xf32>
    %c0_23 = arith.constant 0 : index
    %c24 = arith.constant 24 : index
    %38 = vector.load %arg8[%c0_23, %c24] : memref<8x128xf32, #tpu.memory_space<vmem>>, vector<8x8xf32>
    tpu.vector_store %arg8[%c0_23, %c24], %37 {strides = array<i32>} : memref<8x128xf32, #tpu.memory_space<vmem>>, vector<8x8xf32>,
    %39 = vector.extract_strided_slice %30 {offsets = [32, 0], sizes = [8, 8], strides = [1, 1]} : vector<128x8xf32> to vector<8x8xf32>
    %c0_24 = arith.constant 0 : index
    %c32 = arith.constant 32 : index
    %40 = vector.load %arg8[%c0_24, %c32] : memref<8x128xf32, #tpu.memory_space<vmem>>, vector<8x8xf32>
    tpu.vector_store %arg8[%c0_24, %c32], %39 {strides = array<i32>} : memref<8x128xf32, #tpu.memory_space<vmem>>, vector<8x8xf32>,
    %41 = vector.extract_strided_slice %30 {offsets = [40, 0], sizes = [8, 8], strides = [1, 1]} : vector<128x8xf32> to vector<8x8xf32>
    %c0_25 = arith.constant 0 : index
    %c40 = arith.constant 40 : index
    %42 = vector.load %arg8[%c0_25, %c40] : memref<8x128xf32, #tpu.memory_space<vmem>>, vector<8x8xf32>
    tpu.vector_store %arg8[%c0_25, %c40], %41 {strides = array<i32>} : memref<8x128xf32, #tpu.memory_space<vmem>>, vector<8x8xf32>,
    %43 = vector.extract_strided_slice %30 {offsets = [48, 0], sizes = [8, 8], strides = [1, 1]} : vector<128x8xf32> to vector<8x8xf32>
    %c0_26 = arith.constant 0 : index
    %c48 = arith.constant 48 : index
    %44 = vector.load %arg8[%c0_26, %c48] : memref<8x128xf32, #tpu.memory_space<vmem>>, vector<8x8xf32>
    tpu.vector_store %arg8[%c0_26, %c48], %43 {strides = array<i32>} : memref<8x128xf32, #tpu.memory_space<vmem>>, vector<8x8xf32>,
    %45 = vector.extract_strided_slice %30 {offsets = [56, 0], sizes = [8, 8], strides = [1, 1]} : vector<128x8xf32> to vector<8x8xf32>
    %c0_27 = arith.constant 0 : index
    %c56 = arith.constant 56 : index
    %46 = vector.load %arg8[%c0_27, %c56] : memref<8x128xf32, #tpu.memory_space<vmem>>, vector<8x8xf32>
    tpu.vector_store %arg8[%c0_27, %c56], %45 {strides = array<i32>} : memref<8x128xf32, #tpu.memory_space<vmem>>, vector<8x8xf32>,
    %47 = vector.extract_strided_slice %30 {offsets = [64, 0], sizes = [8, 8], strides = [1, 1]} : vector<128x8xf32> to vector<8x8xf32>
    %c0_28 = arith.constant 0 : index
    %c64 = arith.constant 64 : index
    %48 = vector.load %arg8[%c0_28, %c64] : memref<8x128xf32, #tpu.memory_space<vmem>>, vector<8x8xf32>
    tpu.vector_store %arg8[%c0_28, %c64], %47 {strides = array<i32>} : memref<8x128xf32, #tpu.memory_space<vmem>>, vector<8x8xf32>,
    %49 = vector.extract_strided_slice %30 {offsets = [72, 0], sizes = [8, 8], strides = [1, 1]} : vector<128x8xf32> to vector<8x8xf32>
    %c0_29 = arith.constant 0 : index
    %c72 = arith.constant 72 : index
    %50 = vector.load %arg8[%c0_29, %c72] : memref<8x128xf32, #tpu.memory_space<vmem>>, vector<8x8xf32>
    tpu.vector_store %arg8[%c0_29, %c72], %49 {strides = array<i32>} : memref<8x128xf32, #tpu.memory_space<vmem>>, vector<8x8xf32>,
    %51 = vector.extract_strided_slice %30 {offsets = [80, 0], sizes = [8, 8], strides = [1, 1]} : vector<128x8xf32> to vector<8x8xf32>
    %c0_30 = arith.constant 0 : index
    %c80 = arith.constant 80 : index
    %52 = vector.load %arg8[%c0_30, %c80] : memref<8x128xf32, #tpu.memory_space<vmem>>, vector<8x8xf32>
    tpu.vector_store %arg8[%c0_30, %c80], %51 {strides = array<i32>} : memref<8x128xf32, #tpu.memory_space<vmem>>, vector<8x8xf32>,
    %53 = vector.extract_strided_slice %30 {offsets = [88, 0], sizes = [8, 8], strides = [1, 1]} : vector<128x8xf32> to vector<8x8xf32>
    %c0_31 = arith.constant 0 : index
    %c88 = arith.constant 88 : index
    %54 = vector.load %arg8[%c0_31, %c88] : memref<8x128xf32, #tpu.memory_space<vmem>>, vector<8x8xf32>
    tpu.vector_store %arg8[%c0_31, %c88], %53 {strides = array<i32>} : memref<8x128xf32, #tpu.memory_space<vmem>>, vector<8x8xf32>,
    %55 = vector.extract_strided_slice %30 {offsets = [96, 0], sizes = [8, 8], strides = [1, 1]} : vector<128x8xf32> to vector<8x8xf32>
    %c0_32 = arith.constant 0 : index
    %c96 = arith.constant 96 : index
    %56 = vector.load %arg8[%c0_32, %c96] : memref<8x128xf32, #tpu.memory_space<vmem>>, vector<8x8xf32>
    tpu.vector_store %arg8[%c0_32, %c96], %55 {strides = array<i32>} : memref<8x128xf32, #tpu.memory_space<vmem>>, vector<8x8xf32>,
    %57 = vector.extract_strided_slice %30 {offsets = [104, 0], sizes = [8, 8], strides = [1, 1]} : vector<128x8xf32> to vector<8x8xf32>
    %c0_33 = arith.constant 0 : index
    %c104 = arith.constant 104 : index
    %58 = vector.load %arg8[%c0_33, %c104] : memref<8x128xf32, #tpu.memory_space<vmem>>, vector<8x8xf32>
    tpu.vector_store %arg8[%c0_33, %c104], %57 {strides = array<i32>} : memref<8x128xf32, #tpu.memory_space<vmem>>, vector<8x8xf32>,
    %59 = vector.extract_strided_slice %30 {offsets = [112, 0], sizes = [8, 8], strides = [1, 1]} : vector<128x8xf32> to vector<8x8xf32>
    %c0_34 = arith.constant 0 : index
    %c112 = arith.constant 112 : index
    %60 = vector.load %arg8[%c0_34, %c112] : memref<8x128xf32, #tpu.memory_space<vmem>>, vector<8x8xf32>
    tpu.vector_store %arg8[%c0_34, %c112], %59 {strides = array<i32>} : memref<8x128xf32, #tpu.memory_space<vmem>>, vector<8x8xf32>,
    %61 = vector.extract_strided_slice %30 {offsets = [120, 0], sizes = [8, 8], strides = [1, 1]} : vector<128x8xf32> to vector<8x8xf32>
    %c0_35 = arith.constant 0 : index
    %c120 = arith.constant 120 : index
    %62 = vector.load %arg8[%c0_35, %c120] : memref<8x128xf32, #tpu.memory_space<vmem>>, vector<8x8xf32>
    tpu.vector_store %arg8[%c0_35, %c120], %61 {strides = array<i32>} : memref<8x128xf32, #tpu.memory_space<vmem>>, vector<8x8xf32>,
    return
  }
  func.func @transform_0(%arg0: i32) -> (i32, i32) {
    %c0_i32 = arith.constant 0 : i32
    %c0_i32_0 = arith.constant 0 : i32
    return %arg0, %c0_i32 : i32, i32
  }
  func.func @transform_1(%arg0: i32) -> (i32, i32) {
    %c0_i32 = arith.constant 0 : i32
    %c0_i32_0 = arith.constant 0 : i32
    %c0_i32_1 = arith.constant 0 : i32
    return %c0_i32, %c0_i32_0 : i32, i32
  }
  func.func @transform_2(%arg0: i32) -> (i32, i32) {
    %c0_i32 = arith.constant 0 : i32
    %c0_i32_0 = arith.constant 0 : i32
    %c0_i32_1 = arith.constant 0 : i32
    return %c0_i32, %c0_i32_0 : i32, i32
  }
  func.func @transform_3(%arg0: i32) -> (i32, i32) {
    %c0_i32 = arith.constant 0 : i32
    %c0_i32_0 = arith.constant 0 : i32
    %c0_i32_1 = arith.constant 0 : i32
    return %c0_i32, %c0_i32_0 : i32, i32
  }
  func.func @transform_4(%arg0: i32) -> (i32, i32) {
    %c0_i32 = arith.constant 0 : i32
    %c0_i32_0 = arith.constant 0 : i32
    %c0_i32_1 = arith.constant 0 : i32
    return %c0_i32, %c0_i32_0 : i32, i32
  }
  func.func @transform_5(%arg0: i32) -> (i32, i32) {
    %c0_i32 = arith.constant 0 : i32
    %c0_i32_0 = arith.constant 0 : i32
    %c0_i32_1 = arith.constant 0 : i32
    return %c0_i32, %c0_i32_0 : i32, i32
  }
  func.func @transform_6(%arg0: i32) -> (i32, i32) {
    %c0_i32 = arith.constant 0 : i32
    %c0_i32_0 = arith.constant 0 : i32
    %c0_i32_1 = arith.constant 0 : i32
    return %c0_i32, %c0_i32_0 : i32, i32
  }
  func.func @transform_7(%arg0: i32) -> (i32, i32) {
    %c0_i32 = arith.constant 0 : i32
    %c0_i32_0 = arith.constant 0 : i32
    return %arg0, %c0_i32 : i32, i32
  }
}

</mosaic_0001>

<bundles_post_ra>
// kernel: mine_forward.1
= control target key start
LH: loop header
LB: loop body
LE: loop exit
PB: predicated region body
PF: predicated region fallthrough
CT: control target
= control target key end

     0   :  { %12 = vsyncpa [#allocation3], 0  ;;  %s1533_s24 = smov [#allocation2]   ;;  %s1908_s0 = inlined_call_operand.vmem [shape: f32[1,128], index: 0, kind: input, shape index: {}]   ;;  %s1909_s1 = inlined_call_operand.vmem [shape: bf16[128,256], index: 1, kind: input, shape index: {}]   ;;  %s1910_s2 = inlined_call_operand.vmem [shape: bf16[1,256], index: 2, kind: input, shape index: {}]   ;;  %s1911_s3 = inlined_call_operand.hbm [shape: bf16[256,256], index: 3, kind: input, shape index: {}]   ;;  %s1912_s4 = inlined_call_operand.vmem [shape: bf16[1,256], index: 4, kind: input, shape index: {}]   ;;  %s1913_s5 = inlined_call_operand.vmem [shape: bf16[256,8], index: 5, kind: input, shape index: {}]   ;;  %s1914_s6 = inlined_call_operand.vmem [shape: f32[1,8], index: 6, kind: input, shape index: {}]   ;;  %s1915_s7 = inlined_call_operand.vmem [shape: f32[8,128], index: 7, kind: output, shape index: {}]  }
   0x1   :  { %s24_s25 = sshll.u32 %s1533_s24, 4  ;;  %s25_s25 = int_to_ptr.vmem [resolvable:$true] %s24_s25 }
   0x2   :  { %s1519_s26 = scalar_lea.vmem %s25_s25, 4096  ;;  %p1524_p1 = scmp.lt.s32.totalorder %s25_s25, %s25_s25 }
   0x3   :  { %p1520_p0 = scmp.ne.s32.totalorder %s25_s25, %s1519_s26  ;;  %p1525_p2 = scmp.lt.s32.totalorder %s1519_s26, %s1519_s26 }
   0x5   :  { %p1526_p3 = por %p1525_p2, %p1524_p1 }
   0x7   :  { %p1527_p4 = pnand %p1526_p3, %p1520_p0 }
   0x9   :  { %1530 = shalt.err (!%p1527_p4)
}
   0xa   :  { %s1534_s27 = smov 128   ;;  %s1535_s28 = smov 8  }
   0xb   :  { %30 = dma.hbm_to_vmem [thread:$0]  %s1911_s3, 4096, %s25_s25, [#allocation3], %s1534_s27, %s1534_s27, %s1535_s28  }
   0xc   :  { %1531 = dma.done.wait [#allocation3], 4096  }
   0xd   :  { %1532 = vsyncadd [#allocation3], 4294963200  ;;  %v1536_v0 = vmov 0   ;;  %v1359_v1 = vld [vmem:[%s1909_s1 + $0x74] ss:$8 sps:$4 sm:$0xff]   ;;  %v42_v24 = vld [vmem:[%s1908_s0] sm:$0xff] }
   0xe   :  { %194 = vmatprep.mubr.bf16.mxu0 %v1536_v0  ;;  %v1361_v2 = vld [vmem:[%s1909_s1 + $0x70] ss:$8 sps:$4 sm:$0xff]   ;;  %162 = vmatprep.subr.bf16.mxu0 %v1359_v1  ;;  %v1362_v3 = vld [vmem:[%s1909_s1 + $0x64] ss:$8 sps:$4 sm:$0xff]   ;;  %v1364_v4 = vld [vmem:[%s1909_s1 + $0x60] ss:$8 sps:$4 sm:$0xff]  }
   0xf   :  { %163 = vmatpush1.bf16.msra.mxu0 %v1361_v2  ;;  %v1365_v5 = vld [vmem:[%s1909_s1 + $0x54] ss:$8 sps:$4 sm:$0xff]   ;;  %v1367_v6 = vld [vmem:[%s1909_s1 + $0x50] ss:$8 sps:$4 sm:$0xff]   ;;  %v1368_v7 = vld [vmem:[%s1909_s1 + $0x44] ss:$8 sps:$4 sm:$0xff]  }
  0x10   :  { %164 = vmatprep.subr.bf16.mxu0 %v1362_v3  ;;  %v1370_v8 = vld [vmem:[%s1909_s1 + $0x40] ss:$8 sps:$4 sm:$0xff]   ;;  %v1371_v9 = vld [vmem:[%s1909_s1 + $0x34] ss:$8 sps:$4 sm:$0xff]   ;;  %v1373_v10 = vld [vmem:[%s1909_s1 + $0x30] ss:$8 sps:$4 sm:$0xff]  }
  0x11   :  { %v1374_v11 = vld [vmem:[%s1909_s1 + $0x24] ss:$8 sps:$4 sm:$0xff]   ;;  %v1383_v12 = vld [vmem:[#allocation2 + $0x74] ss:$8 sps:$4 sm:$0xff]   ;;  %v1385_v13 = vld [vmem:[#allocation2 + $0x70] ss:$8 sps:$4 sm:$0xff]  }
  0x12   :  { %v1376_v14 = vld [vmem:[%s1909_s1 + $0x20] ss:$8 sps:$4 sm:$0xff]   ;;  %569 = vmatprep.subr.bf16.mxu1 %v1383_v12  ;;  %v1386_v15 = vld [vmem:[#allocation2 + $0x64] ss:$8 sps:$4 sm:$0xff]   ;;  %v1377_v16 = vld [vmem:[%s1909_s1 + $0x14] ss:$8 sps:$4 sm:$0xff]  }
  0x13   :  { %165 = vmatpush1.bf16.msra.mxu0 %v1364_v4  ;;  %570 = vmatpush1.bf16.msra.mxu1 %v1385_v13  ;;  %v1388_v17 = vld [vmem:[#allocation2 + $0x60] ss:$8 sps:$4 sm:$0xff]   ;;  %v1389_v18 = vld [vmem:[#allocation2 + $0x54] ss:$8 sps:$4 sm:$0xff]   ;;  %v1379_v19 = vld [vmem:[%s1909_s1 + $0x10] ss:$8 sps:$4 sm:$0xff]  }
  0x14   :  { %166 = vmatprep.subr.bf16.mxu0 %v1365_v5  ;;  %571 = vmatprep.subr.bf16.mxu1 %v1386_v15  ;;  %v1380_v20 = vld [vmem:[%s1909_s1 + $0x4] ss:$8 sps:$4 sm:$0xff]   ;;  %v1391_v21 = vld [vmem:[#allocation2 + $0x50] ss:$8 sps:$4 sm:$0xff]   ;;  %v1382_v23 = vld [vmem:[%s1909_s1] ss:$8 sps:$4 sm:$0xff]  }
  0x15   :  { %v1392_v22 = vld [vmem:[#allocation2 + $0x44] ss:$8 sps:$4 sm:$0xff]   ;;  %v1394_v26 = vld [vmem:[#allocation2 + $0x40] ss:$8 sps:$4 sm:$0xff]   ;;  %v1395_v27 = vld [vmem:[#allocation2 + $0x34] ss:$8 sps:$4 sm:$0xff]  }
  0x16   :  { %v43_v25 = vld [vmem:[%s1908_s0 + $0x8] sm:$0xff]  ;;  %v1397_v29 = vld [vmem:[#allocation2 + $0x30] ss:$8 sps:$4 sm:$0xff]   ;;  %v1401_v34 = vld [vmem:[#allocation2 + $0x14] ss:$8 sps:$4 sm:$0xff]   ;;  %vm1096_vm0 = vcmask 64512  }
  0x17   :  { %167 = vmatpush1.bf16.msra.mxu0 %v1367_v6  ;;  %572 = vmatpush1.bf16.msra.mxu1 %v1388_v17  ;;  %v58_v28 = vpack.c.bf16 %v43_v25, %v42_v24  ;;  %v1398_v30 = vld [vmem:[#allocation2 + $0x24] ss:$8 sps:$4 sm:$0xff]   ;;  %v44_v31 = vld [vmem:[%s1908_s0 + $0x10] sm:$0xff]  ;;  %v45_v32 = vld [vmem:[%s1908_s0 + $0x18] sm:$0xff]  ;;  %s1538_s11 = smov 16   ;;  %s1540_s12 = smov 32  }
  0x18   :  { %168 = vmatprep.subr.bf16.mxu0 %v1368_v7  ;;  %573 = vmatprep.subr.bf16.mxu1 %v1389_v18  ;;  %v1400_v33 = vld [vmem:[#allocation2 + $0x20] ss:$8 sps:$4 sm:$0xff]   ;;  %v1403_v35 = vld [vmem:[#allocation2 + $0x10] ss:$8 sps:$4 sm:$0xff]   ;;  %v59_v36 = vpack.c.bf16 %v45_v32, %v44_v31  ;;  %v1404_v37 = vld [vmem:[#allocation2 + $0x4] ss:$8 sps:$4 sm:$0xff]  }
  0x19   :  { %v46_v38 = vld [vmem:[%s1908_s0 + $0x20] sm:$0xff]  ;;  %v47_v39 = vld [vmem:[%s1908_s0 + $0x28] sm:$0xff]  ;;  %v1407_v41 = vld [vmem:[#allocation2 + $0xf4] ss:$8 sps:$4 sm:$0xff]   ;;  %s1541_s13 = smov 40   ;;  %s1542_s3 = smov 48  }
  0x1a   :  { %v1406_v40 = vld [vmem:[#allocation2] ss:$8 sps:$4 sm:$0xff]   ;;  %v60_v42 = vpack.c.bf16 %v47_v39, %v46_v38  ;;  %v1409_v43 = vld [vmem:[#allocation2 + $0xf0] ss:$8 sps:$4 sm:$0xff]   ;;  %v1410_v44 = vld [vmem:[#allocation2 + $0xe4] ss:$8 sps:$4 sm:$0xff]  }
  0x1b   :  { %169 = vmatpush1.bf16.msra.mxu0 %v1370_v8  ;;  %574 = vmatpush1.bf16.msra.mxu1 %v1391_v21  ;;  %v48_v45 = vld [vmem:[%s1908_s0 + $0x30] sm:$0xff]  ;;  %v49_v46 = vld [vmem:[%s1908_s0 + $0x38] sm:$0xff]  ;;  %v1412_v47 = vld [vmem:[#allocation2 + $0xe0] ss:$8 sps:$4 sm:$0xff]   ;;  %s1543_s14 = smov 56   ;;  %s1544_s15 = smov 64  }
  0x1c   :  { %170 = vmatprep.subr.bf16.mxu0 %v1371_v9  ;;  %575 = vmatprep.subr.bf16.mxu1 %v1392_v22  ;;  %v1413_v48 = vld [vmem:[#allocation2 + $0xd4] ss:$8 sps:$4 sm:$0xff]   ;;  %v61_v49 = vpack.c.bf16 %v49_v46, %v48_v45  ;;  %v1415_v50 = vld [vmem:[#allocation2 + $0xd0] ss:$8 sps:$4 sm:$0xff]   ;;  %v1416_v51 = vld [vmem:[#allocation2 + $0xc4] ss:$8 sps:$4 sm:$0xff]   ;;  %v304_v22 = vlaneseq }
  0x1d   :  { %v50_v52 = vld [vmem:[%s1908_s0 + $0x40] sm:$0xff]  ;;  %v51_v53 = vld [vmem:[%s1908_s0 + $0x48] sm:$0xff]  ;;  %v52_v56 = vld [vmem:[%s1908_s0 + $0x50] sm:$0xff]  ;;  %s1545_s16 = smov 72   ;;  %s1546_s17 = smov 80   ;;  %vm1102_vm1 = vcmask 130112  }
  0x1e   :  { %v1418_v54 = vld [vmem:[#allocation2 + $0xc0] ss:$8 sps:$4 sm:$0xff]   ;;  %v62_v55 = vpack.c.bf16 %v51_v53, %v50_v52  ;;  %v53_v57 = vld [vmem:[%s1908_s0 + $0x58] sm:$0xff]  ;;  %v56_v62 = vld [vmem:[%s1908_s0 + $0x70] sm:$0xff]  ;;  %v305_v24 = vshrl.u32 %v304_v22, 7  ;;  %s1547_s18 = smov 88  }
  0x1f   :  { %171 = vmatpush1.bf16.msra.mxu0 %v1373_v10  ;;  %576 = vmatpush1.bf16.msra.mxu1 %v1394_v26  ;;  %v63_v58 = vpack.c.bf16 %v53_v57, %v52_v56  ;;  %v54_v59 = vld [vmem:[%s1908_s0 + $0x60] sm:$0xff]  ;;  %v55_v60 = vld [vmem:[%s1908_s0 + $0x68] sm:$0xff]  ;;  %v57_v63 = vld [vmem:[%s1908_s0 + $0x78] sm:$0xff]  ;;  %s1548_s19 = smov 96   ;;  %s1549_s1 = smov 104   ;;  %vm1108_vm2 = vcmask 195712  }
  0x20   :  { %172 = vmatprep.subr.bf16.mxu0 %v1374_v11  ;;  %577 = vmatprep.subr.bf16.mxu1 %v1395_v27  ;;  %v64_v61 = vpack.c.bf16 %v55_v60, %v54_v59  ;;  %v65_v1 = vpack.c.bf16 %v57_v63, %v56_v62  ;;  %v1419_v2 = vld [vmem:[#allocation2 + $0xb4] ss:$8 sps:$4 sm:$0xff]   ;;  %v1421_v3 = vld [vmem:[#allocation2 + $0xb0] ss:$8 sps:$4 sm:$0xff]   ;;  %v1422_v4 = vld [vmem:[#allocation2 + $0xa4] ss:$8 sps:$4 sm:$0xff]  }
  0x21   :  { %v1424_v5 = vld [vmem:[#allocation2 + $0xa0] ss:$8 sps:$4 sm:$0xff]   ;;  %v1425_v6 = vld [vmem:[#allocation2 + $0x94] ss:$8 sps:$4 sm:$0xff]   ;;  %v1428_v7 = vld [vmem:[#allocation2 + $0x84] ss:$8 sps:$4 sm:$0xff]  }
  0x22   :  { %v1430_v8 = vld [vmem:[#allocation2 + $0x80] ss:$8 sps:$4 sm:$0xff]   ;;  %v1431_v9 = vld [vmem:[%s1913_s5 + $0x78] sm:$0xff]   ;;  %v1433_v11 = vld [vmem:[%s1913_s5 + $0x70] sm:$0xff]   ;;  %v1764_v31 = vsub.s32 0, %v305_v24  ;;  %s1550_s20 = smov 112  }
  0x23   :  { %173 = vmatpush1.bf16.msra.mxu0 %v1376_v14  ;;  %578 = vmatpush1.bf16.msra.mxu1 %v1397_v29  ;;  %v1432_v10 = vld [vmem:[%s1913_s5 + $0x38] sm:$0xff]   ;;  %v1712_v12 = vld [vmem:[%s1913_s5 + $0x30] sm:$0xff]   ;;  %v1717_v13 = vld [vmem:[%s1913_s5 + $0x68] sm:$0xff]   ;;  %s1551_s21 = smov 120   ;;  %vm1114_vm3 = vcmask 261312   ;;  %vm1120_vm4 = vcmask 326912  }
  0x24   :  { %174 = vmatprep.subr.bf16.mxu0 %v1377_v16  ;;  %579 = vmatprep.subr.bf16.mxu1 %v1398_v30  ;;  %v1723_v14 = vld [vmem:[%s1913_s5 + $0x28] sm:$0xff]   ;;  %v1729_v15 = vld [vmem:[%s1913_s5 + $0x60] sm:$0xff]   ;;  %v1741_v17 = vld [vmem:[%s1913_s5 + $0x58] sm:$0xff]   ;;  %vm1126_vm5 = vcmask 392512   ;;  %vm1132_vm6 = vcmask 458112   ;;  %vm1138_vm7 = vcmask 523712  }
  0x25   :  { %v1735_v16 = vld [vmem:[%s1913_s5 + $0x20] sm:$0xff]   ;;  %v1747_v18 = vld [vmem:[%s1913_s5 + $0x18] sm:$0xff]   ;;  %vm1144_vm8 = vcmask 589312   ;;  %vm1150_vm9 = vcmask 654912   ;;  %vm1156_vm10 = vcmask 720512   ;;  %vm1162_vm11 = vcmask 786112  }
  0x26   :  { %v1209_v25 = vld.sshfl [vmem:[%s1910_s2] sm:$0x11 pattern:$0x75316420]  ;;  %vm1168_vm12 = vcmask 851712   ;;  %vm1174_vm13 = vcmask 917312  }
  0x27   :  { %175 = vmatpush1.bf16.msra.mxu0 %v1379_v19  ;;  %580 = vmatpush1.bf16.msra.mxu1 %v1400_v33  ;;  %v1753_v19 = vld [vmem:[%s1913_s5 + $0x50] sm:$0xff]   ;;  %v300_v27 = vcombine.high %v1209_v25, %v1209_v25  ;;  %vm1180_vm14 = vcmask 982912   ;;  %vm1186_vm15 = vcmask 1048512  }
  0x28   :  { %176 = vmatprep.subr.bf16.mxu0 %v1380_v20  ;;  %581 = vmatprep.subr.bf16.mxu1 %v1401_v34  ;;  %v1537_v20 = vmov 1966171168  }
  0x29   :  { %v302_v21 = vunpack.c.l.s4 %v1537_v20 }
  0x2b   :  { %177 = vmatpush1.bf16.msra.mxu0 %v1382_v23  ;;  %582 = vmatpush1.bf16.msra.mxu1 %v1403_v35  ;;  %v303_v23 = vunpack.c.0.s8 %v302_v21 }
  0x2c   :  { %583 = vmatprep.subr.bf16.mxu1 %v1404_v37  ;;  %1260 = vmatprep.subr.bf16.mxu0 %v1431_v9 }
  0x2d   :  { %v1760_v26 = vsub.s32 %v303_v23, %v305_v24 }
  0x2e   :  { %195 = vmatmul.mubr.bf16.vlgmr.msra.gmra.mxu0 %v58_v28 }
  0x2f   :  { %204 = vmatprep.mubr.bf16.mxu0 %v1536_v0  ;;  %584 = vmatpush1.bf16.msra.mxu1 %v1406_v40  ;;  %v307_v28 = vrot.slane %v1209_v25, %v1760_v26  ;;  %v314_v29 = vrot.slane %v300_v27, %v1760_v26 }
  0x30   :  { %585 = vmatprep.subr.bf16.mxu1 %v1407_v41  ;;  %1261 = vmatpush3.bf16.msra.mxu0 %v1432_v10 }
  0x31   :  { %1262 = vmatprep.subr.bf16.mxu0 %v1433_v11  ;;  %v316_v30 = vpack.i.b16 %v307_v28, %v307_v28  ;;  %v323_v33 = vpack.i.b16 %v314_v29, %v314_v29 }
  0x33   :  { %586 = vmatpush2.bf16.msra.mxu1 %v1409_v43  ;;  %v1767_v35 = vrot.slane %v316_v30, %v1764_v31  ;;  %v1770_v38 = vrot.slane %v323_v33, %v1764_v31 }
  0x34   :  { %587 = vmatprep.subr.bf16.mxu1 %v1410_v44  ;;  %1263 = vmatpush3.bf16.msra.mxu0 %v1712_v12 }
  0x35   :  { %1264 = vmatprep.subr.bf16.mxu0 %v1717_v13 }
  0x36   :  { %205 = vmatmul.mubr.bf16.gmra.mxu0 %v59_v36 }
  0x37   :  { %214 = vmatprep.mubr.bf16.mxu0 %v1536_v0  ;;  %588 = vmatpush2.bf16.msra.mxu1 %v1412_v47 }
  0x38   :  { %589 = vmatprep.subr.bf16.mxu1 %v1413_v48  ;;  %1265 = vmatpush3.bf16.msra.mxu0 %v1723_v14 }
  0x39   :  { %1266 = vmatprep.subr.bf16.mxu0 %v1729_v15 }
  0x3b   :  { %590 = vmatpush2.bf16.msra.mxu1 %v1415_v50 }
  0x3c   :  { %591 = vmatprep.subr.bf16.mxu1 %v1416_v51  ;;  %1267 = vmatpush3.bf16.msra.mxu0 %v1735_v16 }
  0x3d   :  { %1268 = vmatprep.subr.bf16.mxu0 %v1741_v17 }
  0x3e   :  { %215 = vmatmul.mubr.bf16.gmra.mxu0 %v60_v42 }
  0x3f   :  { %224 = vmatprep.mubr.bf16.mxu0 %v1536_v0  ;;  %592 = vmatpush2.bf16.msra.mxu1 %v1418_v54 }
  0x40   :  { %593 = vmatprep.subr.bf16.mxu1 %v1419_v2  ;;  %1269 = vmatpush3.bf16.msra.mxu0 %v1747_v18 }
  0x41   :  { %1270 = vmatprep.subr.bf16.mxu0 %v1753_v19 }
  0x43   :  { %594 = vmatpush2.bf16.msra.mxu1 %v1421_v3 }
  0x44   :  { %595 = vmatprep.subr.bf16.mxu1 %v1422_v4 }
  0x46   :  { %225 = vmatmul.mubr.bf16.gmra.mxu0 %v61_v49 }
  0x47   :  { %234 = vmatprep.mubr.bf16.mxu0 %v1536_v0  ;;  %596 = vmatpush2.bf16.msra.mxu1 %v1424_v5 }
  0x48   :  { %597 = vmatprep.subr.bf16.mxu1 %v1425_v6 }
  0x4e   :  { %235 = vmatmul.mubr.bf16.gmra.mxu0 %v62_v55 }
  0x4f   :  { %244 = vmatprep.mubr.bf16.mxu0 %v1536_v0 }
  0x56   :  { %245 = vmatmul.mubr.bf16.gmra.mxu0 %v63_v58 }
  0x57   :  { %254 = vmatprep.mubr.bf16.mxu0 %v1536_v0 }
  0x5e   :  { %255 = vmatmul.mubr.bf16.gmra.mxu0 %v64_v61 }
  0x5f   :  { %264 = vmatprep.mubr.bf16.mxu0 %v1536_v0  ;;  %v1427_v0 = vld [vmem:[#allocation2 + $0x90] ss:$8 sps:$4 sm:$0xff]  }
  0x60   :  { %598 = vmatpush2.bf16.msra.mxu1 %v1427_v0 }
  0x61   :  { %599 = vmatprep.subr.bf16.mxu1 %v1428_v7 }
  0x64   :  { %600 = vmatpush2.bf16.msra.mxu1 %v1430_v8 }
  0x65   :  { %1324 = vmatprep.subr.bf16.mxu1 %v1431_v9 }
  0x66   :  { %265 = vmatmul.mubr.bf16.gmra.mxu0 %v65_v1 }
  0xee   :  { %v196_v32 = vpop.f32.mrf.mxu0 }
  0xf0   :  { %v198_v34 = vpop.f32.mrf.mxu0 }
  0xf2   :  { %v200_v36 = vpop.f32.mrf.mxu0 }
  0xf3   :  { %v275_v37 = vpack.c.bf16 %v200_v36, %v196_v32 }
  0xf4   :  { %v202_v39 = vpop.f32.mrf.mxu0 }
  0xf5   :  { %v329_v40 = vadd.bf16 %v1767_v35, %v275_v37  ;;  %v276_v41 = vpack.c.bf16 %v202_v39, %v198_v34 }
  0xf6   :  { %v206_v42 = vpop.f32.mrf.mxu0 }
  0xf7   :  { %v330_v43 = vadd.bf16 %v1770_v38, %v276_v41  ;;  %v345_v44 = vmul.bf16 1009007652, %v329_v40 }
  0xf8   :  { %v208_v45 = vpop.f32.mrf.mxu0 }
  0xf9   :  { %v346_v46 = vmul.bf16 1009007652, %v330_v43  ;;  %v361_v51 = vmax.bf16 %v345_v44, %v329_v40 }
  0xfa   :  { %v210_v47 = vpop.f32.mrf.mxu0 }
  0xfb   :  { %v277_v48 = vpack.c.bf16 %v210_v47, %v206_v42  ;;  %v362_v49 = vmax.bf16 %v346_v46, %v330_v43 }
  0xfc   :  { %v212_v50 = vpop.f32.mrf.mxu0 }
  0xfd   :  { %v331_v52 = vadd.bf16 %v1767_v35, %v277_v48  ;;  %v278_v53 = vpack.c.bf16 %v212_v50, %v208_v45  ;;  %601 = vmatprep.mubr.bf16.mxu1 %v362_v49 }
  0xfe   :  { %v216_v54 = vpop.f32.mrf.mxu0  ;;  %602 = vmatmul.mubr.bf16.vlgmr.msra.gmra.mxu1 %v361_v51 }
  0xff   :  { %v332_v55 = vadd.bf16 %v1770_v38, %v278_v53  ;;  %1332 = vmatpush3.bf16.msra.mxu1 %v1432_v10  ;;  %v347_v56 = vmul.bf16 1009007652, %v331_v52 }
 0x100   :  { %v218_v57 = vpop.f32.mrf.mxu0  ;;  %1325 = vmatprep.subr.bf16.mxu1 %v1433_v11 }
 0x101   :  { %v348_v58 = vmul.bf16 1009007652, %v332_v55  ;;  %v363_v63 = vmax.bf16 %v347_v56, %v331_v52 }
 0x102   :  { %v220_v59 = vpop.f32.mrf.mxu0 }
 0x103   :  { %v279_v60 = vpack.c.bf16 %v220_v59, %v216_v54  ;;  %v364_v61 = vmax.bf16 %v348_v58, %v332_v55  ;;  %1333 = vmatpush3.bf16.msra.mxu1 %v1712_v12 }
 0x104   :  { %v222_v62 = vpop.f32.mrf.mxu0  ;;  %1326 = vmatprep.subr.bf16.mxu1 %v1717_v13 }
 0x105   :  { %v333_v1 = vadd.bf16 %v1767_v35, %v279_v60  ;;  %v280_v2 = vpack.c.bf16 %v222_v62, %v218_v57  ;;  %611 = vmatprep.mubr.bf16.mxu1 %v364_v61 }
 0x106   :  { %v226_v3 = vpop.f32.mrf.mxu0  ;;  %612 = vmatmul.mubr.bf16.gmra.mxu1 %v363_v63 }
 0x107   :  { %v334_v4 = vadd.bf16 %v1770_v38, %v280_v2  ;;  %1334 = vmatpush3.bf16.msra.mxu1 %v1723_v14  ;;  %v349_v5 = vmul.bf16 1009007652, %v333_v1 }
 0x108   :  { %v228_v6 = vpop.f32.mrf.mxu0  ;;  %1327 = vmatprep.subr.bf16.mxu1 %v1729_v15 }
 0x109   :  { %v350_v0 = vmul.bf16 1009007652, %v334_v4  ;;  %v365_v11 = vmax.bf16 %v349_v5, %v333_v1 }
 0x10a   :  { %v230_v7 = vpop.f32.mrf.mxu0 }
 0x10b   :  { %v281_v8 = vpack.c.bf16 %v230_v7, %v226_v3  ;;  %v366_v9 = vmax.bf16 %v350_v0, %v334_v4  ;;  %1335 = vmatpush3.bf16.msra.mxu1 %v1735_v16  ;;  %v1442_v7 = vld [vmem:[%s1913_s5 + $0x10] sm:$0xff]  }
 0x10c   :  { %v232_v10 = vpop.f32.mrf.mxu0  ;;  %1328 = vmatprep.subr.bf16.mxu1 %v1741_v17  ;;  %1271 = vmatpush3.bf16.msra.mxu0 %v1442_v7 }
 0x10d   :  { %v335_v12 = vadd.bf16 %v1767_v35, %v281_v8  ;;  %v282_v13 = vpack.c.bf16 %v232_v10, %v228_v6  ;;  %621 = vmatprep.mubr.bf16.mxu1 %v366_v9  ;;  %v1445_v8 = vld [vmem:[%s1913_s5 + $0x40] sm:$0xff]  }
 0x10e   :  { %v236_v20 = vpop.f32.mrf.mxu0  ;;  %622 = vmatmul.mubr.bf16.gmra.mxu1 %v365_v11  ;;  %v1446_v9 = vld [vmem:[%s1913_s5] sm:$0xff]  }
 0x10f   :  { %v336_v14 = vadd.bf16 %v1770_v38, %v282_v13  ;;  %1336 = vmatpush3.bf16.msra.mxu1 %v1747_v18  ;;  %v351_v15 = vmul.bf16 1009007652, %v335_v12  ;;  %v1242_v10 = vld.sshfl [vmem:[%s1912_s4] sm:$0x11 pattern:$0x75316420] }
 0x110   :  { %v238_v21 = vpop.f32.mrf.mxu0  ;;  %1329 = vmatprep.subr.bf16.mxu1 %v1753_v19  ;;  %v707_v11 = vcombine.high %v1242_v10, %v1242_v10 }
 0x111   :  { %v352_v22 = vmul.bf16 1009007652, %v336_v14  ;;  %v367_v17 = vmax.bf16 %v351_v15, %v335_v12  ;;  %v714_v12 = vrot.slane %v1242_v10, %v1760_v26 }
 0x112   :  { %v240_v16 = vpop.f32.mrf.mxu0  ;;  %v721_v13 = vrot.slane %v707_v11, %v1760_v26 }
 0x113   :  { %v283_v23 = vpack.c.bf16 %v240_v16, %v236_v20  ;;  %v368_v24 = vmax.bf16 %v352_v22, %v336_v14  ;;  %1337 = vmatpush3.bf16.msra.mxu1 %v1442_v7  ;;  %v723_v20 = vpack.i.b16 %v714_v12, %v714_v12 }
 0x114   :  { %v242_v25 = vpop.f32.mrf.mxu0  ;;  %v730_v15 = vpack.i.b16 %v721_v13, %v721_v13 }
 0x115   :  { %v337_v27 = vadd.bf16 %v1767_v35, %v283_v23  ;;  %v284_v28 = vpack.c.bf16 %v242_v25, %v238_v21  ;;  %631 = vmatprep.mubr.bf16.mxu1 %v368_v24  ;;  %v1817_v22 = vrot.slane %v723_v20, %v1764_v31 }
 0x116   :  { %v246_v29 = vpop.f32.mrf.mxu0  ;;  %632 = vmatmul.mubr.bf16.gmra.mxu1 %v367_v17  ;;  %v1820_v24 = vrot.slane %v730_v15, %v1764_v31 }
 0x117   :  { %v338_v30 = vadd.bf16 %v1770_v38, %v284_v28  ;;  %v353_v32 = vmul.bf16 1009007652, %v337_v27 }
 0x118   :  { %v248_v18 = vpop.f32.mrf.mxu0 }
 0x119   :  { %v354_v33 = vmul.bf16 1009007652, %v338_v30  ;;  %v369_v39 = vmax.bf16 %v353_v32, %v337_v27 }
 0x11a   :  { %v250_v34 = vpop.f32.mrf.mxu0 }
 0x11b   :  { %v285_v36 = vpack.c.bf16 %v250_v34, %v246_v29  ;;  %v370_v19 = vmax.bf16 %v354_v33, %v338_v30 }
 0x11c   :  { %v252_v37 = vpop.f32.mrf.mxu0 }
 0x11d   :  { %v339_v40 = vadd.bf16 %v1767_v35, %v285_v36  ;;  %v286_v41 = vpack.c.bf16 %v252_v37, %v248_v18  ;;  %641 = vmatprep.mubr.bf16.mxu1 %v370_v19 }
 0x11e   :  { %v256_v42 = vpop.f32.mrf.mxu0  ;;  %642 = vmatmul.mubr.bf16.gmra.mxu1 %v369_v39 }
 0x11f   :  { %v340_v43 = vadd.bf16 %v1770_v38, %v286_v41  ;;  %v355_v44 = vmul.bf16 1009007652, %v339_v40 }
 0x120   :  { %v258_v45 = vpop.f32.mrf.mxu0 }
 0x121   :  { %v356_v46 = vmul.bf16 1009007652, %v340_v43  ;;  %v371_v51 = vmax.bf16 %v355_v44, %v339_v40 }
 0x122   :  { %v260_v47 = vpop.f32.mrf.mxu0 }
 0x123   :  { %v287_v48 = vpack.c.bf16 %v260_v47, %v256_v42  ;;  %v372_v49 = vmax.bf16 %v356_v46, %v340_v43 }
 0x124   :  { %v262_v50 = vpop.f32.mrf.mxu0 }
 0x125   :  { %v341_v52 = vadd.bf16 %v1767_v35, %v287_v48  ;;  %v288_v53 = vpack.c.bf16 %v262_v50, %v258_v45  ;;  %651 = vmatprep.mubr.bf16.mxu1 %v372_v49 }
 0x126   :  { %v266_v54 = vpop.f32.mrf.mxu0  ;;  %652 = vmatmul.mubr.bf16.gmra.mxu1 %v371_v51 }
 0x127   :  { %v342_v55 = vadd.bf16 %v1770_v38, %v288_v53  ;;  %v357_v56 = vmul.bf16 1009007652, %v341_v52 }
 0x128   :  { %v268_v57 = vpop.f32.mrf.mxu0 }
 0x129   :  { %v358_v58 = vmul.bf16 1009007652, %v342_v55  ;;  %v373_v63 = vmax.bf16 %v357_v56, %v341_v52 }
 0x12a   :  { %v270_v59 = vpop.f32.mrf.mxu0 }
 0x12b   :  { %v289_v60 = vpack.c.bf16 %v270_v59, %v266_v54  ;;  %v374_v61 = vmax.bf16 %v358_v58, %v342_v55 }
 0x12c   :  { %v272_v62 = vpop.f32.mrf.mxu0 }
 0x12d   :  { %v343_v1 = vadd.bf16 %v1767_v35, %v289_v60  ;;  %v290_v2 = vpack.c.bf16 %v272_v62, %v268_v57  ;;  %661 = vmatprep.mubr.bf16.mxu1 %v374_v61  ;;  %v1443_v35 = vld [vmem:[%s1913_s5 + $0x48] sm:$0xff]  }
 0x12e   :  { %662 = vmatmul.mubr.bf16.gmra.mxu1 %v373_v63  ;;  %1272 = vmatprep.subr.bf16.mxu0 %v1443_v35 }
 0x12f   :  { %v344_v3 = vadd.bf16 %v1770_v38, %v290_v2  ;;  %v359_v4 = vmul.bf16 1009007652, %v343_v1  ;;  %v1444_v38 = vld [vmem:[%s1913_s5 + $0x8] sm:$0xff]   ;;  %1330 = vmatprep.subr.bf16.mxu1 %v1443_v35 }
 0x130   :  { %1273 = vmatpush3.bf16.msra.mxu0 %v1444_v38  ;;  %1338 = vmatpush3.bf16.msra.mxu1 %v1444_v38 }
 0x131   :  { %v360_v5 = vmul.bf16 1009007652, %v344_v3  ;;  %v375_v0 = vmax.bf16 %v359_v4, %v343_v1  ;;  %1274 = vmatprep.subr.bf16.mxu0 %v1445_v8  ;;  %1331 = vmatprep.subr.bf16.mxu1 %v1445_v8 }
 0x133   :  { %v376_v6 = vmax.bf16 %v360_v5, %v344_v3 }
 0x134   :  { %1275 = vmatpush3.bf16.msra.mxu0 %v1446_v9  ;;  %1339 = vmatpush3.bf16.msra.mxu1 %v1446_v9 }
 0x135   :  { %671 = vmatprep.mubr.bf16.mxu1 %v376_v6 }
 0x136   :  { %672 = vmatmul.mubr.bf16.gmra.mxu1 %v375_v0 }
 0x1be   :  { %v603_v14 = vpop.f32.mrf.mxu1 }
 0x1c0   :  { %v605_v21 = vpop.f32.mrf.mxu1 }
 0x1c2   :  { %v607_v16 = vpop.f32.mrf.mxu1 }
 0x1c3   :  { %v682_v23 = vpack.c.bf16 %v607_v16, %v603_v14 }
 0x1c4   :  { %v609_v25 = vpop.f32.mrf.mxu1 }
 0x1c5   :  { %v736_v17 = vadd.bf16 %v1817_v22, %v682_v23  ;;  %v683_v27 = vpack.c.bf16 %v609_v25, %v605_v21 }
 0x1c6   :  { %v613_v28 = vpop.f32.mrf.mxu1 }
 0x1c7   :  { %v737_v29 = vadd.bf16 %v1820_v24, %v683_v27  ;;  %v752_v26 = vmul.bf16 1009007652, %v736_v17 }
 0x1c8   :  { %v615_v30 = vpop.f32.mrf.mxu1 }
 0x1c9   :  { %v753_v32 = vmul.bf16 1009007652, %v737_v29  ;;  %v768_v36 = vmax.bf16 %v752_v26, %v736_v17 }
 0x1ca   :  { %v617_v18 = vpop.f32.mrf.mxu1 }
 0x1cb   :  { %v684_v33 = vpack.c.bf16 %v617_v18, %v613_v28  ;;  %v769_v34 = vmax.bf16 %v753_v32, %v737_v29 }
 0x1cc   :  { %v619_v19 = vpop.f32.mrf.mxu1 }
 0x1cd   :  { %v738_v37 = vadd.bf16 %v1817_v22, %v684_v33  ;;  %v685_v39 = vpack.c.bf16 %v619_v19, %v615_v30  ;;  %951 = vmatprep.mubr.bf16.mxu0 %v769_v34 }
 0x1ce   :  { %v623_v31 = vpop.f32.mrf.mxu1  ;;  %952 = vmatmul.mubr.bf16.vlgmr.msra.gmra.mxu0 %v768_v36 }
 0x1cf   :  { %v739_v40 = vadd.bf16 %v1820_v24, %v685_v39  ;;  %v754_v41 = vmul.bf16 1009007652, %v738_v37 }
 0x1d0   :  { %v625_v42 = vpop.f32.mrf.mxu1 }
 0x1d1   :  { %v755_v43 = vmul.bf16 1009007652, %v739_v40  ;;  %v770_v48 = vmax.bf16 %v754_v41, %v738_v37 }
 0x1d2   :  { %v627_v44 = vpop.f32.mrf.mxu1 }
 0x1d3   :  { %v686_v45 = vpack.c.bf16 %v627_v44, %v623_v31  ;;  %v771_v46 = vmax.bf16 %v755_v43, %v739_v40 }
 0x1d4   :  { %v629_v47 = vpop.f32.mrf.mxu1 }
 0x1d5   :  { %v740_v49 = vadd.bf16 %v1817_v22, %v686_v45  ;;  %v687_v50 = vpack.c.bf16 %v629_v47, %v625_v42  ;;  %959 = vmatprep.mubr.bf16.mxu0 %v771_v46 }
 0x1d6   :  { %v633_v51 = vpop.f32.mrf.mxu1  ;;  %960 = vmatmul.mubr.bf16.gmra.mxu0 %v770_v48 }
 0x1d7   :  { %v741_v52 = vadd.bf16 %v1820_v24, %v687_v50  ;;  %v756_v53 = vmul.bf16 1009007652, %v740_v49 }
 0x1d8   :  { %v635_v54 = vpop.f32.mrf.mxu1 }
 0x1d9   :  { %v757_v55 = vmul.bf16 1009007652, %v741_v52  ;;  %v772_v60 = vmax.bf16 %v756_v53, %v740_v49 }
 0x1da   :  { %v637_v56 = vpop.f32.mrf.mxu1 }
 0x1db   :  { %v688_v57 = vpack.c.bf16 %v637_v56, %v633_v51  ;;  %v773_v58 = vmax.bf16 %v757_v55, %v741_v52  ;;  %v1841_v55 = vld [vmem:[%s1914_s6] ss:$0 sm:$0xff] }
 0x1dc   :  { %v639_v59 = vpop.f32.mrf.mxu1 }
 0x1dd   :  { %v742_v61 = vadd.bf16 %v1817_v22, %v688_v57  ;;  %v689_v62 = vpack.c.bf16 %v639_v59, %v635_v54  ;;  %967 = vmatprep.mubr.bf16.mxu0 %v773_v58 }
 0x1de   :  { %v643_v63 = vpop.f32.mrf.mxu1  ;;  %968 = vmatmul.mubr.bf16.gmra.mxu0 %v772_v60 }
 0x1df   :  { %v743_v1 = vadd.bf16 %v1820_v24, %v689_v62  ;;  %v758_v2 = vmul.bf16 1009007652, %v742_v61 }
 0x1e0   :  { %v645_v3 = vpop.f32.mrf.mxu1 }
 0x1e1   :  { %v759_v4 = vmul.bf16 1009007652, %v743_v1  ;;  %v774_v35 = vmax.bf16 %v758_v2, %v742_v61 }
 0x1e2   :  { %v647_v5 = vpop.f32.mrf.mxu1 }
 0x1e3   :  { %v690_v6 = vpack.c.bf16 %v647_v5, %v643_v63  ;;  %v775_v0 = vmax.bf16 %v759_v4, %v743_v1 }
 0x1e4   :  { %v649_v7 = vpop.f32.mrf.mxu1 }
 0x1e5   :  { %v744_v38 = vadd.bf16 %v1817_v22, %v690_v6  ;;  %v691_v8 = vpack.c.bf16 %v649_v7, %v645_v3  ;;  %975 = vmatprep.mubr.bf16.mxu0 %v775_v0 }
 0x1e6   :  { %v653_v9 = vpop.f32.mrf.mxu1  ;;  %976 = vmatmul.mubr.bf16.gmra.mxu0 %v774_v35 }
 0x1e7   :  { %v745_v10 = vadd.bf16 %v1820_v24, %v691_v8  ;;  %v760_v11 = vmul.bf16 1009007652, %v744_v38 }
 0x1e8   :  { %v655_v12 = vpop.f32.mrf.mxu1 }
 0x1e9   :  { %v761_v13 = vmul.bf16 1009007652, %v745_v10  ;;  %v776_v16 = vmax.bf16 %v760_v11, %v744_v38 }
 0x1ea   :  { %v657_v20 = vpop.f32.mrf.mxu1 }
 0x1eb   :  { %v692_v14 = vpack.c.bf16 %v657_v20, %v653_v9  ;;  %v777_v15 = vmax.bf16 %v761_v13, %v745_v10 }
 0x1ec   :  { %v659_v21 = vpop.f32.mrf.mxu1 }
 0x1ed   :  { %v746_v23 = vadd.bf16 %v1817_v22, %v692_v14  ;;  %v693_v25 = vpack.c.bf16 %v659_v21, %v655_v12  ;;  %983 = vmatprep.mubr.bf16.mxu0 %v777_v15 }
 0x1ee   :  { %v663_v17 = vpop.f32.mrf.mxu1  ;;  %984 = vmatmul.mubr.bf16.gmra.mxu0 %v776_v16 }
 0x1ef   :  { %v747_v27 = vadd.bf16 %v1820_v24, %v693_v25  ;;  %v762_v28 = vmul.bf16 1009007652, %v746_v23 }
 0x1f0   :  { %v665_v29 = vpop.f32.mrf.mxu1 }
 0x1f1   :  { %v763_v26 = vmul.bf16 1009007652, %v747_v27  ;;  %v778_v34 = vmax.bf16 %v762_v28, %v746_v23 }
 0x1f2   :  { %v667_v30 = vpop.f32.mrf.mxu1 }
 0x1f3   :  { %v694_v32 = vpack.c.bf16 %v667_v30, %v663_v17  ;;  %v779_v18 = vmax.bf16 %v763_v26, %v747_v27 }
 0x1f4   :  { %v669_v33 = vpop.f32.mrf.mxu1 }
 0x1f5   :  { %v748_v36 = vadd.bf16 %v1817_v22, %v694_v32  ;;  %v695_v19 = vpack.c.bf16 %v669_v33, %v665_v29  ;;  %991 = vmatprep.mubr.bf16.mxu0 %v779_v18 }
 0x1f6   :  { %v673_v37 = vpop.f32.mrf.mxu1  ;;  %992 = vmatmul.mubr.bf16.gmra.mxu0 %v778_v34 }
 0x1f7   :  { %v749_v39 = vadd.bf16 %v1820_v24, %v695_v19  ;;  %v764_v31 = vmul.bf16 1009007652, %v748_v36 }
 0x1f8   :  { %v675_v40 = vpop.f32.mrf.mxu1 }
 0x1f9   :  { %v765_v41 = vmul.bf16 1009007652, %v749_v39  ;;  %v780_v45 = vmax.bf16 %v764_v31, %v748_v36 }
 0x1fa   :  { %v677_v42 = vpop.f32.mrf.mxu1 }
 0x1fb   :  { %v696_v43 = vpack.c.bf16 %v677_v42, %v673_v37  ;;  %v781_v44 = vmax.bf16 %v765_v41, %v749_v39 }
 0x1fc   :  { %v679_v46 = vpop.f32.mrf.mxu1 }
 0x1fd   :  { %v750_v47 = vadd.bf16 %v1817_v22, %v696_v43  ;;  %v697_v48 = vpack.c.bf16 %v679_v46, %v675_v40  ;;  %999 = vmatprep.mubr.bf16.mxu1 %v781_v44 }
 0x1fe   :  { %1000 = vmatmul.mubr.bf16.vlgmr.msra.gmra.mxu1 %v780_v45 }
 0x1ff   :  { %v751_v49 = vadd.bf16 %v1820_v24, %v697_v48  ;;  %v766_v50 = vmul.bf16 1009007652, %v750_v47 }
 0x201   :  { %v767_v51 = vmul.bf16 1009007652, %v751_v49  ;;  %v782_v53 = vmax.bf16 %v766_v50, %v750_v47 }
 0x203   :  { %v783_v52 = vmax.bf16 %v767_v51, %v751_v49 }
 0x205   :  { %1007 = vmatprep.mubr.bf16.mxu1 %v783_v52 }
 0x206   :  { %1008 = vmatmul.mubr.bf16.gmra.mxu1 %v782_v53 }
 0x28e   :  { %v1276_v54 = vpop.f32.mrf.mxu0 }
 0x290   :  { %v1277_v56 = vpop.f32.mrf.mxu0 }
 0x291   :  { %v1278_v57 = vadd.f32 %v1277_v56, %v1276_v54 }
 0x292   :  { %v1279_v22 = vpop.f32.mrf.mxu0 }
 0x293   :  { %v954_v58 = vadd.f32 %v1278_v57, %v1841_v55 }
 0x294   :  { %v1280_v59 = vpop.f32.mrf.mxu0 }
 0x295   :  { %v1016_v60 = vsub.f32 0.0, %v954_v58  ;;  %v1281_v24 = vadd.f32 %v1280_v59, %v1279_v22 }
 0x296   :  { %v1282_v61 = vpop.f32.mrf.mxu0 }
 0x297   :  { %v1032_v62 = vmul.f32 1.442695, %v1016_v60  ;;  %v957_v63 = vadd.f32 %v1281_v24, %v1841_v55 }
 0x298   :  { %v1283_v1 = vpop.f32.mrf.mxu0 }
 0x299   :  { %1447 = vpow2.f32 %v1032_v62  ;;  %v1017_v2 = vsub.f32 0.0, %v957_v63  ;;  %v1284_v3 = vadd.f32 %v1283_v1, %v1282_v61 }
 0x29a   :  { %v1285_v4 = vpop.f32.mrf.mxu0 }
 0x29b   :  { %v1034_v5 = vmul.f32 1.442695, %v1017_v2  ;;  %v962_v6 = vadd.f32 %v1284_v3, %v1841_v55 }
 0x29c   :  { %v1286_v0 = vpop.f32.mrf.mxu0 }
 0x29d   :  { %1449 = vpow2.f32 %v1034_v5  ;;  %v1018_v7 = vsub.f32 0.0, %v962_v6  ;;  %v1287_v35 = vadd.f32 %v1286_v0, %v1285_v4 }
 0x29e   :  { %v1288_v38 = vpop.f32.mrf.mxu0 }
 0x29f   :  { %v1036_v8 = vmul.f32 1.442695, %v1018_v7  ;;  %v965_v9 = vadd.f32 %v1287_v35, %v1841_v55 }
 0x2a0   :  { %v1289_v10 = vpop.f32.mrf.mxu0 }
 0x2a1   :  { %1451 = vpow2.f32 %v1036_v8  ;;  %v1019_v11 = vsub.f32 0.0, %v965_v9  ;;  %v1290_v12 = vadd.f32 %v1289_v10, %v1288_v38 }
 0x2a2   :  { %v1291_v13 = vpop.f32.mrf.mxu0 }
 0x2a3   :  { %v1038_v20 = vmul.f32 1.442695, %v1019_v11  ;;  %v970_v14 = vadd.f32 %v1290_v12, %v1841_v55 }
 0x2a4   :  { %v1292_v15 = vpop.f32.mrf.mxu0 }
 0x2a5   :  { %1453 = vpow2.f32 %v1038_v20  ;;  %v1020_v21 = vsub.f32 0.0, %v970_v14  ;;  %v1293_v16 = vadd.f32 %v1292_v15, %v1291_v13 }
 0x2a6   :  { %v1448_v23 = vpop.eup %1447  ;;  %v1294_v25 = vpop.f32.mrf.mxu0 }
 0x2a7   :  { %v1064_v17 = vadd.f32 1.0, %v1448_v23  ;;  %v1040_v27 = vmul.f32 1.442695, %v1020_v21  ;;  %v973_v28 = vadd.f32 %v1293_v16, %v1841_v55 }
 0x2a8   :  { %v1295_v29 = vpop.f32.mrf.mxu0 }
 0x2a9   :  { %1455 = vrcp.f32 %v1064_v17  ;;  %v1021_v26 = vsub.f32 0.0, %v973_v28  ;;  %v1296_v30 = vadd.f32 %v1295_v29, %v1294_v25 }
 0x2aa   :  { %v1450_v32 = vpop.eup %1449  ;;  %1457 = vpow2.f32 %v1040_v27  ;;  %v1297_v18 = vpop.f32.mrf.mxu0 }
 0x2ab   :  { %v1042_v33 = vmul.f32 1.442695, %v1021_v26  ;;  %v978_v34 = vadd.f32 %v1296_v30, %v1841_v55  ;;  %v1065_v36 = vadd.f32 1.0, %v1450_v32 }
 0x2ac   :  { %v1298_v19 = vpop.f32.mrf.mxu0 }
 0x2ad   :  { %1459 = vpow2.f32 %v1042_v33  ;;  %v1022_v37 = vsub.f32 0.0, %v978_v34  ;;  %v1299_v39 = vadd.f32 %v1298_v19, %v1297_v18 }
 0x2ae   :  { %v1452_v31 = vpop.eup %1451  ;;  %v1300_v40 = vpop.f32.mrf.mxu0  ;;  %1461 = vrcp.f32 %v1065_v36 }
 0x2af   :  { %v1066_v41 = vadd.f32 1.0, %v1452_v31  ;;  %v1044_v42 = vmul.f32 1.442695, %v1022_v37  ;;  %v981_v43 = vadd.f32 %v1299_v39, %v1841_v55 }
 0x2b0   :  { %v1301_v44 = vpop.f32.mrf.mxu0 }
 0x2b1   :  { %1463 = vrcp.f32 %v1066_v41  ;;  %v1023_v45 = vsub.f32 0.0, %v981_v43  ;;  %v1302_v46 = vadd.f32 %v1301_v44, %v1300_v40 }
 0x2b2   :  { %v1454_v47 = vpop.eup %1453  ;;  %1465 = vpow2.f32 %v1044_v42  ;;  %v1303_v48 = vpop.f32.mrf.mxu0 }
 0x2b3   :  { %v1067_v49 = vadd.f32 1.0, %v1454_v47  ;;  %v1046_v50 = vmul.f32 1.442695, %v1023_v45  ;;  %v986_v51 = vadd.f32 %v1302_v46, %v1841_v55 }
 0x2b4   :  { %v1304_v52 = vpop.f32.mrf.mxu0 }
 0x2b5   :  { %1467 = vrcp.f32 %v1067_v49  ;;  %v1024_v53 = vsub.f32 0.0, %v986_v51  ;;  %v1305_v54 = vadd.f32 %v1304_v52, %v1303_v48 }
 0x2b6   :  { %v1456_v56 = vpop.eup %1455  ;;  %1469 = vpow2.f32 %v1046_v50  ;;  %v1306_v57 = vpop.f32.mrf.mxu0 }
 0x2b7   :  { %v1458_v22 = vpop.eup %1457  ;;  %v1048_v58 = vmul.f32 1.442695, %v1024_v53  ;;  %v989_v59 = vadd.f32 %v1305_v54, %v1841_v55  ;;  %1097 = vst.msk [vmem:[%s1915_s7] sm:$0xff] %vm1096_vm0, %v1456_v56 }
 0x2b8   :  { %v1068_v60 = vadd.f32 1.0, %v1458_v22  ;;  %v1307_v24 = vpop.f32.mrf.mxu0 }
 0x2b9   :  { %1471 = vpow2.f32 %v1048_v58  ;;  %v1025_v61 = vsub.f32 0.0, %v989_v59  ;;  %v1308_v62 = vadd.f32 %v1307_v24, %v1306_v57 }
 0x2ba   :  { %v1460_v63 = vpop.eup %1459  ;;  %1473 = vrcp.f32 %v1068_v60  ;;  %v1309_v1 = vpop.f32.mrf.mxu0 }
 0x2bb   :  { %v1462_v2 = vpop.eup %1461  ;;  %v1069_v3 = vadd.f32 1.0, %v1460_v63  ;;  %v1050_v4 = vmul.f32 1.442695, %v1025_v61  ;;  %v994_v5 = vadd.f32 %v1308_v62, %v1841_v55 }
 0x2bc   :  { %1099 = vrot.lane.b32.xlu0 %v1462_v2, %s1535_s28  ;;  %v1310_v6 = vpop.f32.mrf.mxu0  ;;  %s1539_s28 = smov 24  }
 0x2bd   :  { %1475 = vrcp.f32 %v1069_v3  ;;  %v1026_v0 = vsub.f32 0.0, %v994_v5  ;;  %v1311_v7 = vadd.f32 %v1310_v6, %v1309_v1 }
 0x2be   :  { %v1464_v35 = vpop.eup %1463  ;;  %1477 = vpow2.f32 %v1050_v4  ;;  %v1312_v38 = vpop.f32.mrf.mxu1 }
 0x2bf   :  { %v1466_v8 = vpop.eup %1465  ;;  %v1052_v9 = vmul.f32 1.442695, %v1026_v0  ;;  %v997_v10 = vadd.f32 %v1311_v7, %v1841_v55 }
 0x2c0   :  { %v1070_v11 = vadd.f32 1.0, %v1466_v8  ;;  %1105 = vrot.lane.b32.xlu0 %v1464_v35, %s1538_s11  ;;  %v1313_v12 = vpop.f32.mrf.mxu1 }
 0x2c1   :  { %1479 = vpow2.f32 %v1052_v9  ;;  %v1027_v13 = vsub.f32 0.0, %v997_v10  ;;  %v1314_v20 = vadd.f32 %v1313_v12, %v1312_v38 }
 0x2c2   :  { %v1468_v14 = vpop.eup %1467  ;;  %1481 = vrcp.f32 %v1070_v11  ;;  %v1315_v15 = vpop.f32.mrf.mxu1 }
 0x2c3   :  { %v1470_v21 = vpop.eup %1469  ;;  %v1054_v16 = vmul.f32 1.442695, %v1027_v13  ;;  %v1002_v23 = vadd.f32 %v1314_v20, %v1841_v55  ;;  %1111 = vrot.lane.b32.xlu1 %v1468_v14, %s1539_s28 }
 0x2c4   :  { %v1071_v25 = vadd.f32 1.0, %v1470_v21  ;;  %v1316_v17 = vpop.f32.mrf.mxu1 }
 0x2c5   :  { %1483 = vpow2.f32 %v1054_v16  ;;  %v1028_v27 = vsub.f32 0.0, %v1002_v23  ;;  %v1317_v28 = vadd.f32 %v1316_v17, %v1315_v15 }
 0x2c6   :  { %v1472_v29 = vpop.eup %1471  ;;  %1485 = vrcp.f32 %v1071_v25  ;;  %v1318_v26 = vpop.f32.mrf.mxu1 }
 0x2c7   :  { %v1474_v30 = vpop.eup %1473  ;;  %v1072_v32 = vadd.f32 1.0, %v1472_v29  ;;  %v1056_v18 = vmul.f32 1.442695, %v1028_v27  ;;  %v1005_v33 = vadd.f32 %v1317_v28, %v1841_v55 }
 0x2c8   :  { %1117 = vrot.lane.b32.xlu1 %v1474_v30, %s1540_s12  ;;  %v1319_v34 = vpop.f32.mrf.mxu1 }
 0x2c9   :  { %1487 = vrcp.f32 %v1072_v32  ;;  %v1029_v36 = vsub.f32 0.0, %v1005_v33  ;;  %v1320_v19 = vadd.f32 %v1319_v34, %v1318_v26 }
 0x2ca   :  { %v1476_v37 = vpop.eup %1475  ;;  %1489 = vpow2.f32 %v1056_v18  ;;  %v1321_v39 = vpop.f32.mrf.mxu1 }
 0x2cb   :  { %v1478_v31 = vpop.eup %1477  ;;  %v1058_v40 = vmul.f32 1.442695, %v1029_v36  ;;  %v1010_v41 = vadd.f32 %v1320_v19, %v1841_v55  ;;  %1123 = vrot.lane.b32.xlu0 %v1476_v37, %s1541_s13 }
 0x2cc   :  { %v1073_v42 = vadd.f32 1.0, %v1478_v31  ;;  %v1322_v43 = vpop.f32.mrf.mxu1 }
 0x2cd   :  { %1491 = vpow2.f32 %v1058_v40  ;;  %v1030_v44 = vsub.f32 0.0, %v1010_v41  ;;  %v1323_v45 = vadd.f32 %v1322_v43, %v1321_v39 }
 0x2ce   :  { %v1480_v46 = vpop.eup %1479  ;;  %1493 = vrcp.f32 %v1073_v42 }
 0x2cf   :  { %v1482_v47 = vpop.eup %1481  ;;  %v1074_v48 = vadd.f32 1.0, %v1480_v46  ;;  %v1060_v49 = vmul.f32 1.442695, %v1030_v44  ;;  %v1013_v50 = vadd.f32 %v1323_v45, %v1841_v55 }
 0x2d0   :  { %1129 = vrot.lane.b32.xlu1 %v1482_v47, %s1542_s3 }
 0x2d1   :  { %1495 = vrcp.f32 %v1074_v48  ;;  %v1031_v51 = vsub.f32 0.0, %v1013_v50 }
 0x2d2   :  { %v1484_v52 = vpop.eup %1483  ;;  %1497 = vpow2.f32 %v1060_v49 }
 0x2d3   :  { %v1486_v53 = vpop.eup %1485  ;;  %v1075_v54 = vadd.f32 1.0, %v1484_v52  ;;  %v1062_v56 = vmul.f32 1.442695, %v1031_v51 }
 0x2d4   :  { %1135 = vrot.lane.b32.xlu0 %v1486_v53, %s1543_s14 }
 0x2d5   :  { %1499 = vrcp.f32 %v1075_v54 }
 0x2d6   :  { %v1488_v57 = vpop.eup %1487  ;;  %1501 = vpow2.f32 %v1062_v56 }
 0x2d7   :  { %v1490_v22 = vpop.eup %1489  ;;  %1141 = vrot.lane.b32.xlu1 %v1488_v57, %s1544_s15 }
 0x2d8   :  { %v1076_v58 = vadd.f32 1.0, %v1490_v22 }
 0x2da   :  { %v1492_v59 = vpop.eup %1491  ;;  %1503 = vrcp.f32 %v1076_v58 }
 0x2db   :  { %v1494_v55 = vpop.eup %1493  ;;  %v1077_v60 = vadd.f32 1.0, %v1492_v59 }
 0x2dc   :  { %1147 = vrot.lane.b32.xlu0 %v1494_v55, %s1545_s16 }
 0x2dd   :  { %1505 = vrcp.f32 %v1077_v60 }
 0x2de   :  { %v1496_v24 = vpop.eup %1495 }
 0x2df   :  { %v1498_v61 = vpop.eup %1497  ;;  %1153 = vrot.lane.b32.xlu1 %v1496_v24, %s1546_s17 }
 0x2e0   :  { %v1078_v62 = vadd.f32 1.0, %v1498_v61 }
 0x2e2   :  { %v1500_v63 = vpop.eup %1499  ;;  %1507 = vrcp.f32 %v1078_v62 }
 0x2e3   :  { %v1502_v1 = vpop.eup %1501  ;;  %1159 = vrot.lane.b32.xlu0 %v1500_v63, %s1547_s18 }
 0x2e4   :  { %v1079_v2 = vadd.f32 1.0, %v1502_v1 }
 0x2e6   :  { %1509 = vrcp.f32 %v1079_v2 }
 0x2e7   :  { %v1504_v3 = vpop.eup %1503 }
 0x2e8   :  { %1165 = vrot.lane.b32.xlu1 %v1504_v3, %s1548_s19 }
 0x2ea   :  { %v1506_v4 = vpop.eup %1505 }
 0x2eb   :  { %1171 = vrot.lane.b32.xlu0 %v1506_v4, %s1549_s1 }
 0x2ef   :  { %v1508_v5 = vpop.eup %1507 }
 0x2f0   :  { %1177 = vrot.lane.b32.xlu1 %v1508_v5, %s1550_s20 }
 0x2f3   :  { %v1510_v6 = vpop.eup %1509 }
 0x2f4   :  { %1183 = vrot.lane.b32.xlu0 %v1510_v6, %s1551_s21 }
 0x32e   :  { %v1100_v0 = vpop.permute.xlu0 %1099 }
 0x32f   :  { %1103 = vst.msk [vmem:[%s1915_s7] sm:$0xff] %vm1102_vm1, %v1100_v0 }
 0x332   :  { %v1106_v7 = vpop.permute.xlu0 %1105 }
 0x333   :  { %1109 = vst.msk [vmem:[%s1915_s7] sm:$0xff] %vm1108_vm2, %v1106_v7 }
 0x335   :  { %v1112_v35 = vpop.permute.xlu1 %1111 }
 0x336   :  { %1115 = vst.msk [vmem:[%s1915_s7] sm:$0xff] %vm1114_vm3, %v1112_v35 }
 0x33a   :  { %v1118_v38 = vpop.permute.xlu1 %1117 }
 0x33b   :  { %1121 = vst.msk [vmem:[%s1915_s7] sm:$0xff] %vm1120_vm4, %v1118_v38 }
 0x33d   :  { %v1124_v8 = vpop.permute.xlu0 %1123 }
 0x33e   :  { %1127 = vst.msk [vmem:[%s1915_s7] sm:$0xff] %vm1126_vm5, %v1124_v8 }
 0x342   :  { %v1130_v9 = vpop.permute.xlu1 %1129 }
 0x343   :  { %1133 = vst.msk [vmem:[%s1915_s7] sm:$0xff] %vm1132_vm6, %v1130_v9 }
 0x346   :  { %v1136_v10 = vpop.permute.xlu0 %1135 }
 0x347   :  { %1139 = vst.msk [vmem:[%s1915_s7] sm:$0xff] %vm1138_vm7, %v1136_v10 }
 0x349   :  { %v1142_v11 = vpop.permute.xlu1 %1141 }
 0x34a   :  { %1145 = vst.msk [vmem:[%s1915_s7] sm:$0xff] %vm1144_vm8, %v1142_v11 }
 0x34e   :  { %v1148_v12 = vpop.permute.xlu0 %1147 }
 0x34f   :  { %1151 = vst.msk [vmem:[%s1915_s7] sm:$0xff] %vm1150_vm9, %v1148_v12 }
 0x351   :  { %v1154_v13 = vpop.permute.xlu1 %1153 }
 0x352   :  { %1157 = vst.msk [vmem:[%s1915_s7] sm:$0xff] %vm1156_vm10, %v1154_v13 }
 0x355   :  { %v1160_v20 = vpop.permute.xlu0 %1159 }
 0x356   :  { %1163 = vst.msk [vmem:[%s1915_s7] sm:$0xff] %vm1162_vm11, %v1160_v20 }
 0x35a   :  { %v1166_v14 = vpop.permute.xlu1 %1165 }
 0x35b   :  { %1169 = vst.msk [vmem:[%s1915_s7] sm:$0xff] %vm1168_vm12, %v1166_v14 }
 0x35d   :  { %v1172_v15 = vpop.permute.xlu0 %1171 }
 0x35e   :  { %1175 = vst.msk [vmem:[%s1915_s7] sm:$0xff] %vm1174_vm13, %v1172_v15 }
 0x362   :  { %v1178_v21 = vpop.permute.xlu1 %1177 }
 0x363   :  { %1181 = vst.msk [vmem:[%s1915_s7] sm:$0xff] %vm1180_vm14, %v1178_v21 }
 0x366   :  { %v1184_v16 = vpop.permute.xlu0 %1183 }
 0x367   :  { %1187 = vst.msk [vmem:[%s1915_s7] sm:$0xff] %vm1186_vm15, %v1184_v16 }
 0x368   :  { %1192 = vsyncpa [#allocation3], 1 }

</bundles_post_ra>
